<compile_context>
chip_gen: v7x
topology: tpu7x:2x2x1
jax: 0.10.0
libtpu: 0.0.40
codegen_flags: <defaults>
</compile_context>

<pallas_src>
import numpy as np

import jax
import jax.numpy as jnp
from jax.experimental import pallas as pl
from jax.experimental.pallas import tpu as pltpu


# ----------------------------- Pallas kernel ------------------------------ #
def _decoder_kernel(
    tok_ref,         # SMEM (T,) int32 token ids (scalar prefetch; used by index_maps)
    hidden0_ref,     # (1, H)    f32  initial hidden state (read at step 0 only)
    enc_ref,         # (L, H)    bf16 encoder outputs
    emb_ref,         # (1, 1, H) bf16 gathered embedding row for this step
    attn_w_ref,      # (2H, L)   bf16 fused attn Linear weight (rows: [emb | h])
    comb_w_ref,      # (2H, H)   bf16 fused attn_combine weight (rows: [emb | attn_applied])
    w_ih_ref,        # (H, 3H)   bf16 fused GRU input weights  (cols: [r | z | n])
    w_hh_ref,        # (H, 3H)   bf16 fused GRU hidden weights (cols: [r | z | n])
    out_w_ref,       # (H, V)    bf16 output projection
    bias_ref,        # (8, BM)   f32  packed biases (rows: attn, comb, b_ih, b_hh, out)
    out_ref,         # (1, 8, BM) f32 packed per-step output slab
    h_scratch,       # (1, H)    f32  VMEM scratch: hidden state carried across steps
):
    f32 = jnp.float32
    H = hidden0_ref.shape[-1]
    L = enc_ref.shape[0]
    V = out_w_ref.shape[-1]
    BM = bias_ref.shape[-1]

    t = pl.program_id(0)

    @pl.when(t == 0)
    def _():
        h_scratch[...] = hidden0_ref[...]

    emb = emb_ref[0]                       # (1, H) bf16 — the selected embedding row
    h_f32 = h_scratch[...]                 # (1, H) f32  — previous hidden state
    h = h_f32.astype(emb.dtype)            # bf16 copy for MXU inputs

    bias = bias_ref[...]                   # single (8, BM) f32 load
    attn_b = bias[0:1, 0:L]
    comb_b = bias[1:2, 0:H]
    b_ih = bias[2:3, 0:3 * H]
    b_hh = bias[3:4, 0:3 * H]
    out_b = bias[4:5, 0:V]

    # dropout: identity (eval-mode semantics)

    # attn logits = Linear(cat([emb, h], dim=1)) == emb @ W[:H] + h @ W[H:] + b
    logits = (jnp.dot(emb, attn_w_ref[0:H, :], preferred_element_type=f32)
              + jnp.dot(h, attn_w_ref[H:2 * H, :], preferred_element_type=f32)
              + attn_b)                                            # (1, L) f32

    # softmax over dim=1 (denominator reciprocal on the EUP slot)
    m = jnp.max(logits, axis=1, keepdims=True)
    e = jnp.exp(logits - m)
    inv = pl.reciprocal(jnp.sum(e, axis=1, keepdims=True), approx=True)
    aw = e * inv                                                   # (1, L) f32

    # attn_applied = bmm(aw, encoder_outs) -> (1, H)
    attn_applied = jnp.dot(aw.astype(enc_ref.dtype), enc_ref[...],
                           preferred_element_type=f32)             # (1, H) f32

    # attn_combine(cat([emb, attn_applied], dim=1)) then ReLU
    xc = (jnp.dot(emb, comb_w_ref[0:H, :], preferred_element_type=f32)
          + jnp.dot(attn_applied.astype(emb.dtype), comb_w_ref[H:2 * H, :],
                    preferred_element_type=f32)
          + comb_b)                                                # (1, H) f32
    x = jnp.maximum(xc, 0.0)

    # single-step GRU, fused gate matmuls (PyTorch nn.GRU equations, order r,z,n)
    gi = jnp.dot(x.astype(emb.dtype), w_ih_ref[...],
                 preferred_element_type=f32) + b_ih                # (1, 3H) f32
    gh = jnp.dot(h, w_hh_ref[...],
                 preferred_element_type=f32) + b_hh                # (1, 3H) f32
    i_r, i_z, i_n = gi[:, 0:H], gi[:, H:2 * H], gi[:, 2 * H:3 * H]
    h_r, h_z, h_n = gh[:, 0:H], gh[:, H:2 * H], gh[:, 2 * H:3 * H]
    r = jax.nn.sigmoid(i_r + h_r)
    z = jax.nn.sigmoid(i_z + h_z)
    n = jnp.tanh(i_n + r * h_n)                 # b_hn inside r*(...) as in PyTorch
    h_new = (1.0 - z) * n + z * h_f32                              # (1, H) f32

    # out = self.out(gru_out[0])  (gru_out[0] == h_new for a 1-step GRU); raw logits
    out = jnp.dot(h_new.astype(emb.dtype), out_w_ref[...],
                  preferred_element_type=f32) + out_b              # (1, V) f32

    # carry hidden state to the next decode step
    h_scratch[...] = h_new

    # one lane-dense (8, BM) store: rows = [logits | h_new | attn_weights | 0...]
    def lane_pad(v):
        pad = BM - v.shape[-1]
        v = v.astype(f32)
        if pad == 0:
            return v
        return jnp.concatenate([v, jnp.zeros((v.shape[0], pad), f32)], axis=-1)

    slab = jnp.concatenate(
        [lane_pad(out), lane_pad(h_new), lane_pad(aw), jnp.zeros((5, BM), f32)],
        axis=0)                                                    # (8, BM) f32
    out_ref[0] = slab


# --------------------------- parameters & wrapper -------------------------- #
def init_decoder_params(key, output_lang_size, hidden_size, max_len):
    """Deterministic PyTorch-like init (uniform(-1/sqrt(fan_in), +))."""
    H, L, V = hidden_size, max_len, output_lang_size
    ks = list(jax.random.split(key, 12))

    def u(k, shape, fan_in):
        bound = 1.0 / jnp.sqrt(jnp.float32(fan_in))
        return jax.random.uniform(k, shape, jnp.float32, -bound, bound)

    p = {}
    p["embedding"] = jax.random.normal(ks[0], (V, H), jnp.float32)     # nn.Embedding
    p["attn_w"] = u(ks[1], (L, 2 * H), 2 * H)                          # nn.Linear(2H, L)
    p["attn_b"] = u(ks[2], (L,), 2 * H)
    p["comb_w"] = u(ks[3], (H, 2 * H), 2 * H)                          # nn.Linear(2H, H)
    p["comb_b"] = u(ks[4], (H,), 2 * H)
    p["gru_w_ih"] = u(ks[5], (3 * H, H), H)                            # nn.GRU
    p["gru_w_hh"] = u(ks[6], (3 * H, H), H)
    p["gru_b_ih"] = u(ks[7], (3 * H,), H)
    p["gru_b_hh"] = u(ks[8], (3 * H,), H)
    p["out_w"] = u(ks[9], (V, H), H)                                   # nn.Linear(H, V)
    p["out_b"] = u(ks[10], (V,), H)
    return p


def prepare_params(params):
    """One-time weight prep: transpose to (in, out), fuse GRU gates, pack biases,
    cast matmul weights to bf16. Run once before the decode loop."""
    V, H = params["embedding"].shape
    L = params["attn_w"].shape[0]
    bf16 = jnp.bfloat16

    bm = max(L, H, 3 * H, V)
    bm = ((bm + 127) // 128) * 128                      # lane-pad the bias/out slab
    bias = jnp.zeros((8, bm), jnp.float32)
    bias = bias.at[0, :L].set(params["attn_b"])
    bias = bias.at[1, :H].set(params["comb_b"])
    bias = bias.at[2, :3 * H].set(params["gru_b_ih"])
    bias = bias.at[3, :3 * H].set(params["gru_b_hh"])
    bias = bias.at[4, :V].set(params["out_b"])

    return {
        "emb": params["embedding"].astype(bf16).reshape(V, 1, H),   # row-gatherable
        "attn_w": params["attn_w"].T.astype(bf16),                  # (2H, L)
        "comb_w": params["comb_w"].T.astype(bf16),                  # (2H, H)
        "w_ih": params["gru_w_ih"].T.astype(bf16),                  # (H, 3H) cols [r|z|n]
        "w_hh": params["gru_w_hh"].T.astype(bf16),                  # (H, 3H) cols [r|z|n]
        "out_w": params["out_w"].T.astype(bf16),                    # (H, V)
        "bias": bias,                                               # (8, BM) f32
    }


def decoder_decode(prep, tokens, hidden, encoder_outs):
    """Teacher-forced multi-step decode in ONE pallas_call.
    tokens: int32 (T,), hidden: (1,1,H), encoder_outs: (L,H).
    Returns (logits (T,V), final hidden (1,1,H), attn_weights (T,L))."""
    f32 = jnp.float32
    L, H = encoder_outs.shape
    V = prep["out_w"].shape[-1]
    BM = prep["bias"].shape[-1]
    T = tokens.shape[0]

    grid_spec = pltpu.PrefetchScalarGridSpec(
        num_scalar_prefetch=1,
        grid=(T,),
        in_specs=[
            pl.BlockSpec((1, H), lambda t, tok: (0, 0)),                # hidden0
            pl.BlockSpec((L, H), lambda t, tok: (0, 0)),                # encoder outs
            pl.BlockSpec((1, 1, H), lambda t, tok: (tok[t], 0, 0)),     # emb row, step t
            pl.BlockSpec((2 * H, L), lambda t, tok: (0, 0)),            # attn_w
            pl.BlockSpec((2 * H, H), lambda t, tok: (0, 0)),            # comb_w
            pl.BlockSpec((H, 3 * H), lambda t, tok: (0, 0)),            # w_ih
            pl.BlockSpec((H, 3 * H), lambda t, tok: (0, 0)),            # w_hh
            pl.BlockSpec((H, V), lambda t, tok: (0, 0)),                # out_w
            pl.BlockSpec((8, BM), lambda t, tok: (0, 0)),               # packed biases
        ],
        out_specs=pl.BlockSpec((1, 8, BM), lambda t, tok: (t, 0, 0)),   # packed outputs
        scratch_shapes=[pltpu.VMEM((1, H), jnp.float32)],               # hidden carry
    )

    packed = pl.pallas_call(
        _decoder_kernel,
        out_shape=jax.ShapeDtypeStruct((T, 8, BM), f32),
        grid_spec=grid_spec,
        compiler_params=pltpu.CompilerParams(dimension_semantics=("arbitrary",)),
    )(
        tokens.astype(jnp.int32),                        # scalar prefetch
        hidden.reshape(1, H).astype(f32),                # once per decode call
        encoder_outs.astype(jnp.bfloat16),               # once per decode call
        prep["emb"],
        prep["attn_w"], prep["comb_w"],
        prep["w_ih"], prep["w_hh"],
        prep["out_w"], prep["bias"],
    )

    logits = packed[:, 0, :V]                            # (T, V)
    hiddens = packed[:, 1, :H]                           # (T, H)
    aw = packed[:, 2, :L]                                # (T, L)
    return logits, hiddens[T - 1].reshape(1, 1, H), aw


def decoder_forward(prep, token, hidden, encoder_outs):
    """Single decode step — matches Decoder.forward(x, hidden, encoder_outs)."""
    logits, h_new, aw = decoder_decode(prep, token.reshape(1), hidden, encoder_outs)
    return logits, h_new, aw          # (1,V), (1,1,H), (1,L)


# --------------------------- pure-JAX f32 reference ------------------------ #
def decoder_reference(params, token, hidden, encoder_outs):
    H = params["embedding"].shape[1]
    emb = params["embedding"][token[0]].reshape(1, H)
    h = hidden.reshape(1, H)
    logits = jnp.concatenate([emb, h], axis=1) @ params["attn_w"].T + params["attn_b"]
    aw = jax.nn.softmax(logits, axis=1)
    attn_applied = aw @ encoder_outs
    x = jnp.concatenate([emb, attn_applied], axis=1) @ params["comb_w"].T + params["comb_b"]
    x = jax.nn.relu(x)
    gi = x @ params["gru_w_ih"].T + params["gru_b_ih"]
    gh = h @ params["gru_w_hh"].T + params["gru_b_hh"]
    i_r, i_z, i_n = jnp.split(gi, 3, axis=1)
    h_r, h_z, h_n = jnp.split(gh, 3, axis=1)
    r = jax.nn.sigmoid(i_r + h_r)
    z = jax.nn.sigmoid(i_z + h_z)
    n = jnp.tanh(i_n + r * h_n)
    h_new = (1.0 - z) * n + z * h
    out = h_new @ params["out_w"].T + params["out_b"]
    return out, h_new.reshape(1, 1, H), aw


# ---------------------------------- main ----------------------------------- #
if __name__ == "__main__":
    output_lang_size = 20   # V
    hidden_size = 32        # H
    max_len = 10            # L

    key = jax.random.PRNGKey(0)
    k_par, k_enc = jax.random.split(key, 2)

    params = init_decoder_params(k_par, output_lang_size, hidden_size, max_len)
    prep = prepare_params(params)                      # one-time weight prep

    token = jnp.array([3], dtype=jnp.int32)                       # decoder input id
    hidden = jnp.zeros((1, 1, hidden_size), jnp.float32)          # init_hidden()
    encoder_outs = jax.random.normal(k_enc, (max_len, hidden_size), jnp.float32)

    # --- single step (== Decoder.forward) -------------------------------- #
    step = jax.jit(decoder_forward)
    out, new_hidden, attn_weights = step(prep, token, hidden, encoder_outs)
    jax.block_until_ready((out, new_hidden, attn_weights))

    assert out.shape == (1, output_lang_size)
    assert new_hidden.shape == (1, 1, hidden_size)
    assert attn_weights.shape == (1, max_len)

    ref_out, ref_h, ref_aw = decoder_reference(params, token, hidden, encoder_outs)
    np.testing.assert_allclose(np.asarray(out), np.asarray(ref_out), rtol=5e-2, atol=5e-2)
    np.testing.assert_allclose(np.asarray(new_hidden), np.asarray(ref_h), rtol=5e-2, atol=5e-2)
    np.testing.assert_allclose(np.asarray(attn_weights), np.asarray(ref_aw), rtol=5e-2, atol=5e-2)

    # --- fused multi-step teacher-forced decode (time loop inside kernel) -- #
    tokens = jnp.array([1, 4, 7, 2, 9, 5], dtype=jnp.int32)
    decode = jax.jit(decoder_decode)
    logits_seq, final_h, aw_seq = decode(prep, tokens, hidden, encoder_outs)
    jax.block_until_ready((logits_seq, final_h, aw_seq))

    assert logits_seq.shape == (tokens.shape[0], output_lang_size)
    assert final_h.shape == (1, 1, hidden_size)
    assert aw_seq.shape == (tokens.shape[0], max_len)

    print("KERNEL_OK")
</pallas_src>

<mosaic_0001>
module attributes {stable_mosaic.version = 11 : i64} {
  func.func @_decoder_kernel(%arg0: i32, %arg1: memref<1xi32, #tpu.memory_space<smem>>, %arg2: memref<1x32xf32, #tpu.memory_space<vmem>>, %arg3: memref<10x32xbf16, #tpu.memory_space<vmem>>, %arg4: memref<1x1x32xbf16, #tpu.memory_space<vmem>>, %arg5: memref<64x10xbf16, #tpu.memory_space<vmem>>, %arg6: memref<64x32xbf16, #tpu.memory_space<vmem>>, %arg7: memref<32x96xbf16, #tpu.memory_space<vmem>>, %arg8: memref<32x96xbf16, #tpu.memory_space<vmem>>, %arg9: memref<32x20xbf16, #tpu.memory_space<vmem>>, %arg10: memref<8x128xf32, #tpu.memory_space<vmem>>, %arg11: memref<1x8x128xf32, #tpu.memory_space<vmem>>, %arg12: memref<1x32xf32, #tpu.memory_space<vmem>>) attributes {dimension_semantics = [#tpu.dimension_semantics<arbitrary>], iteration_bounds = array<i64: 1>, scalar_prefetch = 1 : i64, scratch_operands = 1 : i64, tpu.core_type = #tpu.core_type<tc>, window_params = [{pipeline_mode = #tpu.pipeline_mode<synchronous>, transform_indices = @transform_0, window_bounds = array<i64: 1, 32>}, {pipeline_mode = #tpu.pipeline_mode<synchronous>, transform_indices = @transform_1, window_bounds = array<i64: 10, 32>}, {transform_indices = @transform_2, window_bounds = array<i64: 1, 1, 32>}, {pipeline_mode = #tpu.pipeline_mode<synchronous>, transform_indices = @transform_3, window_bounds = array<i64: 64, 10>}, {pipeline_mode = #tpu.pipeline_mode<synchronous>, transform_indices = @transform_4, window_bounds = array<i64: 64, 32>}, {pipeline_mode = #tpu.pipeline_mode<synchronous>, transform_indices = @transform_5, window_bounds = array<i64: 32, 96>}, {pipeline_mode = #tpu.pipeline_mode<synchronous>, transform_indices = @transform_6, window_bounds = array<i64: 32, 96>}, {pipeline_mode = #tpu.pipeline_mode<synchronous>, transform_indices = @transform_7, window_bounds = array<i64: 32, 20>}, {pipeline_mode = #tpu.pipeline_mode<synchronous>, transform_indices = @transform_8, window_bounds = array<i64: 8, 128>}, {transform_indices = @transform_9, window_bounds = array<i64: 1, 8, 128>}]} {
    %c0_i32 = arith.constant 0 : i32
    %0 = arith.cmpi eq, %arg0, %c0_i32 : i32
    %1 = arith.extui %0 : i1 to i32
    %c0_i32_0 = arith.constant 0 : i32
    %2 = arith.cmpi ne, %1, %c0_i32_0 : i32
    scf.if %2 {
      %c0_44 = arith.constant 0 : index
      %c0_45 = arith.constant 0 : index
      %90 = vector.load %arg2[%c0_44, %c0_45] : memref<1x32xf32, #tpu.memory_space<vmem>>, vector<1x32xf32>
      %c0_46 = arith.constant 0 : index
      %c0_47 = arith.constant 0 : index
      %91 = vector.load %arg12[%c0_46, %c0_47] : memref<1x32xf32, #tpu.memory_space<vmem>>, vector<1x32xf32>
      tpu.vector_store %arg12[%c0_46, %c0_47], %90 {strides = array<i32>} : memref<1x32xf32, #tpu.memory_space<vmem>>, vector<1x32xf32>,
    } else {
    }
    %c0 = arith.constant 0 : index
    %c0_1 = arith.constant 0 : index
    %c0_2 = arith.constant 0 : index
    %3 = vector.load %arg4[%c0, %c0_1, %c0_2] : memref<1x1x32xbf16, #tpu.memory_space<vmem>>, vector<1x1x32xbf16>
    %4 = vector.shape_cast %3 : vector<1x1x32xbf16> to vector<1x32xbf16>
    %c0_3 = arith.constant 0 : index
    %c0_4 = arith.constant 0 : index
    %5 = vector.load %arg12[%c0_3, %c0_4] : memref<1x32xf32, #tpu.memory_space<vmem>>, vector<1x32xf32>
    %6 = arith.truncf %5 : vector<1x32xf32> to vector<1x32xbf16>
    %c0_5 = arith.constant 0 : index
    %c0_6 = arith.constant 0 : index
    %7 = vector.load %arg10[%c0_5, %c0_6] : memref<8x128xf32, #tpu.memory_space<vmem>>, vector<8x128xf32>
    %8 = vector.extract_strided_slice %7 {offsets = [0, 0], sizes = [1, 10], strides = [1, 1]} : vector<8x128xf32> to vector<1x10xf32>
    %9 = vector.extract_strided_slice %7 {offsets = [1, 0], sizes = [1, 32], strides = [1, 1]} : vector<8x128xf32> to vector<1x32xf32>
    %10 = vector.extract_strided_slice %7 {offsets = [2, 0], sizes = [1, 96], strides = [1, 1]} : vector<8x128xf32> to vector<1x96xf32>
    %11 = vector.extract_strided_slice %7 {offsets = [3, 0], sizes = [1, 96], strides = [1, 1]} : vector<8x128xf32> to vector<1x96xf32>
    %12 = vector.extract_strided_slice %7 {offsets = [4, 0], sizes = [1, 20], strides = [1, 1]} : vector<8x128xf32> to vector<1x20xf32>
    %c0_7 = arith.constant 0 : index
    %c0_8 = arith.constant 0 : index
    %13 = vector.load %arg5[%c0_7, %c0_8] : memref<64x10xbf16, #tpu.memory_space<vmem>>, vector<32x10xbf16>
    %cst = arith.constant dense<0.000000e+00> : vector<1x10xf32>
    %14 = tpu.matmul %4, %13, %cst {dimension_numbers = #tpu.dot_dimension_numbers<[1], [0], [0], [1], [0, 0, 1, 1], [], []>} : vector<1x32xbf16>, vector<32x10xbf16>, vector<1x10xf32> -> vector<1x10xf32>
    %c32 = arith.constant 32 : index
    %c0_9 = arith.constant 0 : index
    %15 = vector.load %arg5[%c32, %c0_9] : memref<64x10xbf16, #tpu.memory_space<vmem>>, vector<32x10xbf16>
    %cst_10 = arith.constant dense<0.000000e+00> : vector<1x10xf32>
    %16 = tpu.matmul %6, %15, %cst_10 {dimension_numbers = #tpu.dot_dimension_numbers<[1], [0], [0], [1], [0, 0, 1, 1], [], []>} : vector<1x32xbf16>, vector<32x10xbf16>, vector<1x10xf32> -> vector<1x10xf32>
    %17 = arith.addf %14, %16 : vector<1x10xf32>
    %18 = arith.addf %17, %8 : vector<1x10xf32>
    %cst_11 = arith.constant dense<0xFF800000> : vector<1xf32>
    %19 = vector.multi_reduction <maximumf>, %18, %cst_11 [1] : vector<1x10xf32> to vector<1xf32>
    %20 = vector.shape_cast %19 : vector<1xf32> to vector<1x1xf32>
    %21 = vector.broadcast %20 : vector<1x1xf32> to vector<1x10xf32>
    %22 = arith.subf %18, %21 : vector<1x10xf32>
    %23 = math.exp %22 : vector<1x10xf32>
    %cst_12 = arith.constant dense<0.000000e+00> : vector<1xf32>
    %24 = vector.multi_reduction <add>, %23, %cst_12 [1] : vector<1x10xf32> to vector<1xf32>
    %25 = vector.shape_cast %24 : vector<1xf32> to vector<1x1xf32>
    %26 = tpu.reciprocal %25 {approx = true} : vector<1x1xf32> -> vector<1x1xf32>
    %27 = vector.broadcast %26 : vector<1x1xf32> to vector<1x10xf32>
    %28 = arith.mulf %23, %27 : vector<1x10xf32>
    %29 = arith.truncf %28 : vector<1x10xf32> to vector<1x10xbf16>
    %c0_13 = arith.constant 0 : index
    %c0_14 = arith.constant 0 : index
    %30 = vector.load %arg3[%c0_13, %c0_14] : memref<10x32xbf16, #tpu.memory_space<vmem>>, vector<10x32xbf16>
    %cst_15 = arith.constant dense<0.000000e+00> : vector<1x32xf32>
    %31 = tpu.matmul %29, %30, %cst_15 {dimension_numbers = #tpu.dot_dimension_numbers<[1], [0], [0], [1], [0, 0, 1, 1], [], []>} : vector<1x10xbf16>, vector<10x32xbf16>, vector<1x32xf32> -> vector<1x32xf32>
    %c0_16 = arith.constant 0 : index
    %c0_17 = arith.constant 0 : index
    %32 = vector.load %arg6[%c0_16, %c0_17] : memref<64x32xbf16, #tpu.memory_space<vmem>>, vector<32x32xbf16>
    %cst_18 = arith.constant dense<0.000000e+00> : vector<1x32xf32>
    %33 = tpu.matmul %4, %32, %cst_18 {dimension_numbers = #tpu.dot_dimension_numbers<[1], [0], [0], [1], [0, 0, 1, 1], [], []>} : vector<1x32xbf16>, vector<32x32xbf16>, vector<1x32xf32> -> vector<1x32xf32>
    %34 = arith.truncf %31 : vector<1x32xf32> to vector<1x32xbf16>
    %c32_19 = arith.constant 32 : index
    %c0_20 = arith.constant 0 : index
    %35 = vector.load %arg6[%c32_19, %c0_20] : memref<64x32xbf16, #tpu.memory_space<vmem>>, vector<32x32xbf16>
    %cst_21 = arith.constant dense<0.000000e+00> : vector<1x32xf32>
    %36 = tpu.matmul %34, %35, %cst_21 {dimension_numbers = #tpu.dot_dimension_numbers<[1], [0], [0], [1], [0, 0, 1, 1], [], []>} : vector<1x32xbf16>, vector<32x32xbf16>, vector<1x32xf32> -> vector<1x32xf32>
    %37 = arith.addf %33, %36 : vector<1x32xf32>
    %38 = arith.addf %37, %9 : vector<1x32xf32>
    %cst_22 = arith.constant 0.000000e+00 : f32
    %39 = vector.broadcast %cst_22 : f32 to vector<1x32xf32>
    %40 = arith.maximumf %38, %39 : vector<1x32xf32>
    %41 = arith.truncf %40 : vector<1x32xf32> to vector<1x32xbf16>
    %c0_23 = arith.constant 0 : index
    %c0_24 = arith.constant 0 : index
    %42 = vector.load %arg7[%c0_23, %c0_24] : memref<32x96xbf16, #tpu.memory_space<vmem>>, vector<32x96xbf16>
    %cst_25 = arith.constant dense<0.000000e+00> : vector<1x96xf32>
    %43 = tpu.matmul %41, %42, %cst_25 {dimension_numbers = #tpu.dot_dimension_numbers<[1], [0], [0], [1], [0, 0, 1, 1], [], []>} : vector<1x32xbf16>, vector<32x96xbf16>, vector<1x96xf32> -> vector<1x96xf32>
    %44 = arith.addf %43, %10 : vector<1x96xf32>
    %c0_26 = arith.constant 0 : index
    %c0_27 = arith.constant 0 : index
    %45 = vector.load %arg8[%c0_26, %c0_27] : memref<32x96xbf16, #tpu.memory_space<vmem>>, vector<32x96xbf16>
    %cst_28 = arith.constant dense<0.000000e+00> : vector<1x96xf32>
    %46 = tpu.matmul %6, %45, %cst_28 {dimension_numbers = #tpu.dot_dimension_numbers<[1], [0], [0], [1], [0, 0, 1, 1], [], []>} : vector<1x32xbf16>, vector<32x96xbf16>, vector<1x96xf32> -> vector<1x96xf32>
    %47 = arith.addf %46, %11 : vector<1x96xf32>
    %48 = vector.extract_strided_slice %44 {offsets = [0, 0], sizes = [1, 32], strides = [1, 1]} : vector<1x96xf32> to vector<1x32xf32>
    %49 = vector.extract_strided_slice %44 {offsets = [0, 32], sizes = [1, 32], strides = [1, 1]} : vector<1x96xf32> to vector<1x32xf32>
    %50 = vector.extract_strided_slice %44 {offsets = [0, 64], sizes = [1, 32], strides = [1, 1]} : vector<1x96xf32> to vector<1x32xf32>
    %51 = vector.extract_strided_slice %47 {offsets = [0, 0], sizes = [1, 32], strides = [1, 1]} : vector<1x96xf32> to vector<1x32xf32>
    %52 = vector.extract_strided_slice %47 {offsets = [0, 32], sizes = [1, 32], strides = [1, 1]} : vector<1x96xf32> to vector<1x32xf32>
    %53 = vector.extract_strided_slice %47 {offsets = [0, 64], sizes = [1, 32], strides = [1, 1]} : vector<1x96xf32> to vector<1x32xf32>
    %54 = arith.addf %48, %51 : vector<1x32xf32>
    %55 = arith.negf %54 : vector<1x32xf32>
    %56 = math.exp %55 : vector<1x32xf32>
    %cst_29 = arith.constant 1.000000e+00 : f32
    %57 = vector.broadcast %cst_29 : f32 to vector<1x32xf32>
    %58 = arith.addf %57, %56 : vector<1x32xf32>
    %59 = arith.divf %57, %58 : vector<1x32xf32>
    %60 = arith.addf %49, %52 : vector<1x32xf32>
    %61 = arith.negf %60 : vector<1x32xf32>
    %62 = math.exp %61 : vector<1x32xf32>
    %cst_30 = arith.constant 1.000000e+00 : f32
    %63 = vector.broadcast %cst_30 : f32 to vector<1x32xf32>
    %64 = arith.addf %63, %62 : vector<1x32xf32>
    %65 = arith.divf %63, %64 : vector<1x32xf32>
    %66 = arith.mulf %59, %53 : vector<1x32xf32>
    %67 = arith.addf %50, %66 : vector<1x32xf32>
    %68 = math.tanh %67 : vector<1x32xf32>
    %cst_31 = arith.constant 1.000000e+00 : f32
    %69 = vector.broadcast %cst_31 : f32 to vector<1x32xf32>
    %70 = arith.subf %69, %65 : vector<1x32xf32>
    %71 = arith.mulf %70, %68 : vector<1x32xf32>
    %72 = arith.mulf %65, %5 : vector<1x32xf32>
    %73 = arith.addf %71, %72 : vector<1x32xf32>
    %74 = arith.truncf %73 : vector<1x32xf32> to vector<1x32xbf16>
    %c0_32 = arith.constant 0 : index
    %c0_33 = arith.constant 0 : index
    %75 = vector.load %arg9[%c0_32, %c0_33] : memref<32x20xbf16, #tpu.memory_space<vmem>>, vector<32x20xbf16>
    %cst_34 = arith.constant dense<0.000000e+00> : vector<1x20xf32>
    %76 = tpu.matmul %74, %75, %cst_34 {dimension_numbers = #tpu.dot_dimension_numbers<[1], [0], [0], [1], [0, 0, 1, 1], [], []>} : vector<1x32xbf16>, vector<32x20xbf16>, vector<1x20xf32> -> vector<1x20xf32>
    %77 = arith.addf %76, %12 : vector<1x20xf32>
    %c0_35 = arith.constant 0 : index
    %c0_36 = arith.constant 0 : index
    %78 = vector.load %arg12[%c0_35, %c0_36] : memref<1x32xf32, #tpu.memory_space<vmem>>, vector<1x32xf32>
    tpu.vector_store %arg12[%c0_35, %c0_36], %73 {strides = array<i32>} : memref<1x32xf32, #tpu.memory_space<vmem>>, vector<1x32xf32>,
    %cst_37 = arith.constant 0.000000e+00 : f32
    %79 = vector.broadcast %cst_37 : f32 to vector<1x108xf32>
    %80 = tpu.concatenate %77, %79 in 1 : vector<1x20xf32>, vector<1x108xf32> -> vector<1x128xf32>
    %cst_38 = arith.constant 0.000000e+00 : f32
    %81 = vector.broadcast %cst_38 : f32 to vector<1x96xf32>
    %82 = tpu.concatenate %73, %81 in 1 : vector<1x32xf32>, vector<1x96xf32> -> vector<1x128xf32>
    %cst_39 = arith.constant 0.000000e+00 : f32
    %83 = vector.broadcast %cst_39 : f32 to vector<1x118xf32>
    %84 = tpu.concatenate %28, %83 in 1 : vector<1x10xf32>, vector<1x118xf32> -> vector<1x128xf32>
    %cst_40 = arith.constant 0.000000e+00 : f32
    %85 = vector.broadcast %cst_40 : f32 to vector<5x128xf32>
    %86 = tpu.concatenate %80, %82, %84, %85 in 0 : vector<1x128xf32>, vector<1x128xf32>, vector<1x128xf32>, vector<5x128xf32> -> vector<8x128xf32>
    %c0_41 = arith.constant 0 : index
    %c0_42 = arith.constant 0 : index
    %c0_43 = arith.constant 0 : index
    %87 = vector.load %arg11[%c0_41, %c0_42, %c0_43] : memref<1x8x128xf32, #tpu.memory_space<vmem>>, vector<1x8x128xf32>
    %88 = vector.shape_cast %87 : vector<1x8x128xf32> to vector<8x128xf32>
    %89 = vector.shape_cast %86 : vector<8x128xf32> to vector<1x8x128xf32>
    tpu.vector_store %arg11[%c0_41, %c0_42, %c0_43], %89 {strides = array<i32>} : memref<1x8x128xf32, #tpu.memory_space<vmem>>, vector<1x8x128xf32>,
    return
  }
  func.func @transform_0(%arg0: i32, %arg1: memref<1xi32, #tpu.memory_space<smem>>) -> (i32, i32) {
    %c0_i32 = arith.constant 0 : i32
    %c0_i32_0 = arith.constant 0 : i32
    %c0_i32_1 = arith.constant 0 : i32
    return %c0_i32, %c0_i32_0 : i32, i32
  }
  func.func @transform_1(%arg0: i32, %arg1: memref<1xi32, #tpu.memory_space<smem>>) -> (i32, i32) {
    %c0_i32 = arith.constant 0 : i32
    %c0_i32_0 = arith.constant 0 : i32
    %c0_i32_1 = arith.constant 0 : i32
    return %c0_i32, %c0_i32_0 : i32, i32
  }
  func.func @transform_2(%arg0: i32, %arg1: memref<1xi32, #tpu.memory_space<smem>>) -> (i32, i32, i32) {
    %0 = arith.index_cast %arg0 : i32 to index
    %1 = memref.load %arg1[%0] : memref<1xi32, #tpu.memory_space<smem>>
    %c0_i32 = arith.constant 0 : i32
    %c0_i32_0 = arith.constant 0 : i32
    %c0_i32_1 = arith.constant 0 : i32
    return %1, %c0_i32, %c0_i32_0 : i32, i32, i32
  }
  func.func @transform_3(%arg0: i32, %arg1: memref<1xi32, #tpu.memory_space<smem>>) -> (i32, i32) {
    %c0_i32 = arith.constant 0 : i32
    %c0_i32_0 = arith.constant 0 : i32
    %c0_i32_1 = arith.constant 0 : i32
    return %c0_i32, %c0_i32_0 : i32, i32
  }
  func.func @transform_4(%arg0: i32, %arg1: memref<1xi32, #tpu.memory_space<smem>>) -> (i32, i32) {
    %c0_i32 = arith.constant 0 : i32
    %c0_i32_0 = arith.constant 0 : i32
    %c0_i32_1 = arith.constant 0 : i32
    return %c0_i32, %c0_i32_0 : i32, i32
  }
  func.func @transform_5(%arg0: i32, %arg1: memref<1xi32, #tpu.memory_space<smem>>) -> (i32, i32) {
    %c0_i32 = arith.constant 0 : i32
    %c0_i32_0 = arith.constant 0 : i32
    %c0_i32_1 = arith.constant 0 : i32
    return %c0_i32, %c0_i32_0 : i32, i32
  }
  func.func @transform_6(%arg0: i32, %arg1: memref<1xi32, #tpu.memory_space<smem>>) -> (i32, i32) {
    %c0_i32 = arith.constant 0 : i32
    %c0_i32_0 = arith.constant 0 : i32
    %c0_i32_1 = arith.constant 0 : i32
    return %c0_i32, %c0_i32_0 : i32, i32
  }
  func.func @transform_7(%arg0: i32, %arg1: memref<1xi32, #tpu.memory_space<smem>>) -> (i32, i32) {
    %c0_i32 = arith.constant 0 : i32
    %c0_i32_0 = arith.constant 0 : i32
    %c0_i32_1 = arith.constant 0 : i32
    return %c0_i32, %c0_i32_0 : i32, i32
  }
  func.func @transform_8(%arg0: i32, %arg1: memref<1xi32, #tpu.memory_space<smem>>) -> (i32, i32) {
    %c0_i32 = arith.constant 0 : i32
    %c0_i32_0 = arith.constant 0 : i32
    %c0_i32_1 = arith.constant 0 : i32
    return %c0_i32, %c0_i32_0 : i32, i32
  }
  func.func @transform_9(%arg0: i32, %arg1: memref<1xi32, #tpu.memory_space<smem>>) -> (i32, i32, i32) {
    %c0_i32 = arith.constant 0 : i32
    %c0_i32_0 = arith.constant 0 : i32
    %c0_i32_1 = arith.constant 0 : i32
    return %arg0, %c0_i32, %c0_i32_0 : i32, i32, i32
  }
}

</mosaic_0001>

<bundles_post_ra>
// kernel: decoder_forward.1
= control target key start
LH: loop header
LB: loop body
LE: loop exit
PB: predicated region body
PF: predicated region fallthrough
CT: control target
= control target key end

     0   :  { %v757_v0 = vmov 0.0   ;;  %vm758_vm0 = vmmov 0   ;;  %vm54_vm1 = vcmask 253952   ;;  %vm80_vm2 = vcmask 261120   ;;  %s759_s22 = smov 64   ;;  %s761_s25 = smov 96   ;;  %s938_s4 = inlined_call_operand.vmem [shape: bf16[64,10], index: 4, kind: input, shape index: {}]   ;;  %s939_s0 = inlined_call_operand.<no memory space> [shape: s32[1], index: 0, kind: input, shape index: {}]   ;;  %s940_s3 = inlined_call_operand.vmem [shape: bf16[20,1,32], index: 3, kind: input, shape index: {}]   ;;  %s941_s1 = inlined_call_operand.vmem [shape: f32[1,32], index: 1, kind: input, shape index: {}]   ;;  %s942_s9 = inlined_call_operand.vmem [shape: f32[8,128], index: 9, kind: input, shape index: {}]   ;;  %s943_s2 = inlined_call_operand.vmem [shape: bf16[10,32], index: 2, kind: input, shape index: {}]   ;;  %s944_s5 = inlined_call_operand.vmem [shape: bf16[64,32], index: 5, kind: input, shape index: {}]   ;;  %s945_s7 = inlined_call_operand.vmem [shape: bf16[32,96], index: 7, kind: input, shape index: {}]   ;;  %s946_s6 = inlined_call_operand.vmem [shape: bf16[32,96], index: 6, kind: input, shape index: {}]   ;;  %s947_s8 = inlined_call_operand.vmem [shape: bf16[32,20], index: 8, kind: input, shape index: {}]   ;;  %s948_s10 = inlined_call_operand.vmem [shape: f32[1,8,128], index: 10, kind: output, shape index: {}]  }
   0x1   :  { %673 = vmatprep.subr.bf16.mxu1 %v757_v0  ;;  %665 = vmatprep.subr.bf16.mxu0 %v757_v0  ;;  %v732_v1 = vld [vmem:[%s938_s4] sm:$0xff]   ;;  %p44_p0 = scmp.lt.s32.totalorder %s939_s0, 19  ;;  %v733_v2 = vld [vmem:[%s938_s4 + $0x10] sm:$0xff]   ;;  %v734_v3 = vld [vmem:[%s938_s4 + $0x8] sm:$0xff]   ;;  %vm180_vm3 = vcmask 73728   ;;  %vm204_vm4 = vcmask 1044480  }
   0x2   :  { %677 = vmatprep.mubr.msk.bf16.mxu1 %vm758_vm0, %v757_v0  ;;  %669 = vmatprep.mubr.msk.bf16.mxu0 %vm758_vm0, %v757_v0  ;;  %v735_v4 = vld [vmem:[%s938_s4 + $0x18] sm:$0xff]   ;;  %v53_v5 = vld [vmem:[%s941_s1] sm:$0x1]  ;;  %v738_v28 = vld [vmem:[%s944_s5 + $0x10] sm:$0xff]   ;;  %vm200_vm5 = vcmask 80896   ;;  %vm594_vm6 = vcmask 162816  }
   0x3   :  { %674 = vmatpush3.bf16.msra.mxu1 %v732_v1  ;;  %s950_s0 = smov (!%p44_p0, %s939_s0), 19  ;;  %666 = vmatpush3.bf16.msra.mxu0 %v733_v2  ;;  %55 = vst.msk [vmem:[#allocation2] sm:$0x1] %vm54_vm1, %v53_v5  ;;  %v865_v14 = vld [vmem:[%s942_s9] sm:$0xff]  ;;  %v740_v29 = vld [vmem:[%s944_s5 + $0x18] sm:$0xff]   ;;  %v739_v36 = vld [vmem:[%s944_s5 + $0x8] sm:$0xff]  }
   0x4   :  { %675 = vmatprep.subr.bf16.mxu1 %v757_v0  ;;  %667 = vmatprep.subr.bf16.mxu0 %v757_v0  ;;  %s46_s27 = scalar_lea.vmem %s940_s3, %s950_s0  ;;  %v736_v26 = vld [vmem:[%s943_s2] sm:$0x1f]   ;;  %v742_v38 = vld [vmem:[%s945_s7 + $0x8] sm:$0xff]   ;;  %v447_v50 = vrot.slane %v865_v14, 3  ;;  %v365_v56 = vrot.slane %v865_v14, 1  ;;  %v386_v2 = vrot.slane %v865_v14, 2 }
   0x5   :  { %v56_v6 = vld [vmem:[%s46_s27] sm:$0x1]  ;;  %v206_v27 = vsel %vm204_vm4, %v736_v26, 0  ;;  %v744_v49 = vld [vmem:[%s946_s6 + $0x8] sm:$0xff]   ;;  %vm604_vm7 = vcmask 1040384   ;;  %vm606_vm8 = vcmask 1041408  }
   0x6   :  { %v737_v33 = vld [vmem:[%s944_s5] sm:$0xff]   ;;  %vm608_vm9 = vcmask 1042432  }
   0x7   :  { %676 = vmatpush3.bf16.msra.mxu1 %v734_v3  ;;  %668 = vmatpush3.bf16.msra.mxu0 %v735_v4  ;;  %v741_v37 = vld [vmem:[%s945_s7] sm:$0xff]  }
   0x8   :  { %687 = vmatprep.subr.bf16.mxu1 %v757_v0  ;;  %681 = vmatprep.subr.bf16.mxu0 %v757_v0  ;;  %v743_v48 = vld [vmem:[%s946_s6] sm:$0xff]   ;;  %s760_s6 = smov 32  }
   0xa   :  { %678 = vmatmul.mubr.msk.bf16.vlgmr.msra.gmra.mrb[0].mxu1 %vm80_vm2, %v56_v6  ;;  %v855_v7 = vld [vmem:[#allocation2] sm:$0x1] }
   0xb   :  { %691 = vmatprep.mubr.msk.bf16.mxu1 %vm758_vm0, %v757_v0  ;;  %v58_v8 = vpack.c.bf16 %v855_v7, %v855_v7  ;;  %688 = vmatpush3.bf16.msra.mxu1 %v738_v28 }
   0xc   :  { %689 = vmatprep.subr.bf16.mxu1 %v757_v0 }
   0xd   :  { %670 = vmatmul.mubr.msk.bf16.vlgmr.msra.gmra.mrb[0].mxu0 %vm80_vm2, %v58_v8 }
   0xe   :  { %683 = vmatprep.mubr.msk.bf16.mxu0 %vm758_vm0, %v757_v0  ;;  %682 = vmatpush3.bf16.msra.mxu0 %v206_v27 }
   0xf   :  { %695 = vmatprep.subr.bf16.mxu0 %v757_v0  ;;  %690 = vmatpush3.bf16.msra.mxu1 %v740_v29 }
  0x10   :  { %703 = vmatprep.subr.bf16.mxu1 %v757_v0 }
  0xdd   :  { %v173_v9 = vpop.f32.mrb[0].mxu1 }
  0xde   :  { %v679_v10 = vpop.f32.mrb[1].mxu1 }
  0xdf   :  { %v176_v11 = vpop.f32.mrb[2].mxu1 }
  0xe0   :  { %v680_v12 = vpop.f32.mrb[3].mxu1  ;;  %v118_v13 = vpop.f32.mrb[0].mxu0 }
  0xe1   :  { %v174_v15 = vadd.f32 %v173_v9, %v118_v13  ;;  %v671_v16 = vpop.f32.mrb[1].mxu0  ;;  %v514_v13 = vlaneseq }
  0xe2   :  { %v121_v17 = vpop.f32.mrb[2].mxu0 }
  0xe3   :  { %v672_v18 = vpop.f32.mrb[3].mxu0  ;;  %v179_v19 = vadd.f32 %v174_v15, %v865_v14  ;;  %v515_v15 = vshrl.u32 %v514_v13, 7 }
  0xe5   :  { %v181_v20 = vsel %vm180_vm3, %v179_v19, -inf  ;;  %v516_v17 = vsub.s32 0, %v515_v15 }
  0xe6   :  { %182 = vmax.xlane.f32.xlu0 %v181_v20 }
  0xe7   :  { %v517_v20 = vrot.slane %v855_v7, %v516_v17 }
 0x173   :  { %v183_v21 = vpop.xlane.xlu0 %182 }
 0x174   :  { %v184_v22 = vsub.f32 %v179_v19, %v183_v21 }
 0x176   :  { %v185_v23 = vmul.f32 1.442695, %v184_v22 }
 0x178   :  { %747 = vpow2.f32 %v185_v23  ;;  %v745_v23 = vld [vmem:[%s947_s8] sm:$0xff]  }
 0x182   :  { %v748_v24 = vpop.eup %747 }
 0x183   :  { %v187_v25 = vsel %vm180_vm3, %v748_v24, 0.0 }
 0x184   :  { %188 = vadd.xlane.f32.xlu0 %v187_v25  ;;  %v746_v25 = vld [vmem:[%s947_s8 + $0x8] sm:$0xff]  }
 0x211   :  { %v189_v30 = vpop.xlane.xlu0 %188 }
 0x212   :  { %749 = vrcp.f32 %v189_v30 }
 0x21c   :  { %v750_v31 = vpop.eup %749 }
 0x21d   :  { %v191_v32 = vmul.f32 %v750_v31, %v748_v24 }
 0x21f   :  { %v192_v34 = vpack.c.bf16 %v191_v32, %v191_v32  ;;  %v883_v35 = vsel %vm200_vm5, %v191_v32, 0.0 }
 0x221   :  { %684 = vmatmul.mubr.msk.bf16.vlgmr.msra.gmra.mrb[4].mxu0 %vm200_vm5, %v192_v34  ;;  %v543_v34 = vrot.slane %v865_v14, 4 }
 0x222   :  { %696 = vmatpush3.bf16.msra.mxu0 %v737_v33  ;;  %699 = vmatprep.mubr.msk.bf16.mxu0 %vm758_vm0, %v757_v0 }
 0x223   :  { %697 = vmatprep.subr.bf16.mxu0 %v757_v0 }
 0x226   :  { %698 = vmatpush3.bf16.msra.mxu0 %v739_v36 }
 0x227   :  { %711 = vmatprep.subr.bf16.mxu0 %v757_v0 }
 0x229   :  { %700 = vmatmul.mubr.msk.bf16.vlgmr.msra.gmra.mrb[8].mxu0 %vm80_vm2, %v56_v6 }
 0x22a   :  { %715 = vmatprep.mubr.msk.bf16.mxu0 %vm758_vm0, %v757_v0  ;;  %712 = vmatpush3.bf16.msra.mxu0 %v741_v37 }
 0x22b   :  { %713 = vmatprep.subr.bf16.mxu0 %v757_v0 }
 0x22e   :  { %714 = vmatpush3.bf16.msra.mxu0 %v742_v38 }
 0x231   :  { %716 = vmatmul.mubr.msk.bf16.vlgmr.msra.gmra.mrb[12].mxu0 %vm80_vm2, %v58_v8 }
 0x2f4   :  { %v242_v39 = vpop.f32.mrb[4].mxu0 }
 0x2f5   :  { %v252_v40 = vpack.c.bf16 %v242_v39, %v242_v39  ;;  %v685_v41 = vpop.f32.mrb[5].mxu0 }
 0x2f6   :  { %v245_v42 = vpop.f32.mrb[6].mxu0  ;;  %v602_v41 = vrot.slane %v883_v35, 6 }
 0x2f7   :  { %v686_v43 = vpop.f32.mrb[7].mxu0  ;;  %692 = vmatmul.mubr.msk.bf16.vlgmr.msra.gmra.mrb[4].mxu1 %vm80_vm2, %v252_v40 }
 0x2f8   :  { %707 = vmatprep.mubr.msk.bf16.mxu1 %vm758_vm0, %v757_v0  ;;  %704 = vmatpush3.bf16.msra.mxu1 %v743_v48 }
 0x2f9   :  { %705 = vmatprep.subr.bf16.mxu1 %v757_v0 }
 0x2fc   :  { %v358_v44 = vpop.f32.mrb[8].mxu0  ;;  %706 = vmatpush3.bf16.msra.mxu1 %v744_v49 }
 0x2fd   :  { %v701_v45 = vpop.f32.mrb[9].mxu0  ;;  %719 = vmatprep.subr.bf16.mxu1 %v757_v0 }
 0x2fe   :  { %v361_v46 = vpop.f32.mrb[10].mxu0 }
 0x2ff   :  { %v702_v47 = vpop.f32.mrb[11].mxu0 }
 0x304   :  { %v483_v51 = vpop.f32.mrb[12].mxu0 }
 0x305   :  { %v484_v52 = vadd.f32 %v483_v51, %v447_v50  ;;  %v717_v53 = vpop.f32.mrb[13].mxu0 }
 0x306   :  { %v486_v54 = vpop.f32.mrb[14].mxu0 }
 0x307   :  { %v718_v55 = vpop.f32.mrb[15].mxu0  ;;  %497 = vrot.lane.b32.xlu1 %v484_v52, %s759_s22 }
 0x379   :  { %v498_v16 = vpop.permute.xlu1 %497 }
 0x3ca   :  { %v306_v57 = vpop.f32.mrb[4].mxu1 }
 0x3cb   :  { %v359_v58 = vadd.f32 %v358_v44, %v306_v57  ;;  %v693_v59 = vpop.f32.mrb[5].mxu1 }
 0x3cc   :  { %v309_v60 = vpop.f32.mrb[6].mxu1 }
 0x3cd   :  { %v367_v61 = vadd.f32 %v365_v56, %v359_v58  ;;  %v694_v62 = vpop.f32.mrb[7].mxu1 }
 0x3cf   :  { %v368_v63 = vmax.f32 %v367_v61, 0.0 }
 0x3d1   :  { %v369_v1 = vpack.c.bf16 %v368_v63, %v368_v63 }
 0x3d3   :  { %708 = vmatmul.mubr.msk.bf16.vlgmr.msra.gmra.mrb[8].mxu1 %vm80_vm2, %v369_v1 }
 0x3d4   :  { %723 = vmatprep.mubr.msk.bf16.mxu1 %vm758_vm0, %v757_v0  ;;  %720 = vmatpush3.bf16.msra.mxu1 %v745_v23 }
 0x3d5   :  { %721 = vmatprep.subr.bf16.mxu1 %v757_v0 }
 0x3d8   :  { %722 = vmatpush3.bf16.msra.mxu1 %v746_v25 }
 0x4a6   :  { %v425_v3 = vpop.f32.mrb[8].mxu1 }
 0x4a7   :  { %v426_v4 = vadd.f32 %v425_v3, %v386_v2  ;;  %v709_v5 = vpop.f32.mrb[9].mxu1 }
 0x4a8   :  { %v428_v6 = vpop.f32.mrb[10].mxu1 }
 0x4a9   :  { %v489_v8 = vadd.f32 %v484_v52, %v426_v4  ;;  %v710_v9 = vpop.f32.mrb[11].mxu1 }
 0x4ab   :  { %v638_v10 = vmul.f32 -1.442695, %v489_v8 }
 0x4ad   :  { %751 = vpow2.f32 %v638_v10 }
 0x4b7   :  { %v752_v11 = vpop.eup %751 }
 0x4b8   :  { %v493_v12 = vadd.f32 1.0, %v752_v11 }
 0x4ba   :  { %753 = vrcp.f32 %v493_v12 }
 0x4c4   :  { %v754_v18 = vpop.eup %753 }
 0x4c5   :  { %v500_v19 = vmul.f32 %v754_v18, %v498_v16  ;;  %v507_v26 = vsub.f32 1.0, %v754_v18 }
 0x4c7   :  { %502 = vrot.lane.b32.xlu1 %v500_v19, %s759_s22 }
 0x4cb   :  { %518 = vrot.lane.b32.xlu1 %v517_v20, %s760_s6 }
 0x539   :  { %v503_v21 = vpop.permute.xlu1 %502 }
 0x53a   :  { %v505_v22 = vadd.f32 %v503_v21, %v426_v4 }
 0x53c   :  { %755 = vtanh.f32 %v505_v22 }
 0x53d   :  { %v519_v7 = vpop.permute.xlu1 %518 }
 0x53e   :  { %v521_v28 = vmul.f32 %v754_v18, %v519_v7 }
 0x546   :  { %v756_v24 = vpop.eup %755 }
 0x547   :  { %509 = vrot.lane.b32.xlu0 %v756_v24, %s761_s25 }
 0x5b9   :  { %v510_v27 = vpop.permute.xlu0 %509 }
 0x5ba   :  { %v512_v29 = vmul.f32 %v510_v27, %v507_v26 }
 0x5bc   :  { %v522_v30 = vadd.f32 %v521_v28, %v512_v29 }
 0x5be   :  { %v523_v31 = vpack.c.bf16 %v522_v30, %v522_v30 }
 0x5c0   :  { %529 = vrot.lane.b32.xlu1 %v523_v31, %s761_s25 }
 0x5c4   :  { %589 = vrot.lane.b32.xlu1 %v522_v30, %s761_s25 }
 0x632   :  { %v530_v32 = vpop.permute.xlu1 %529 }
 0x633   :  { %724 = vmatmul.mubr.msk.bf16.vlgmr.msra.gmra.mrb[12].mxu1 %vm80_vm2, %v530_v32 }
 0x636   :  { %v590_v33 = vpop.permute.xlu1 %589 }
 0x637   :  { %593 = vst.msk [vmem:[#allocation2] sm:$0x1] %vm54_vm1, %v590_v33  ;;  %v596_v0 = vsel %vm80_vm2, %v590_v33, 0.0 }
 0x638   :  { %v599_v39 = vrot.slane %v596_v0, 7 }
 0x706   :  { %v582_v36 = vpop.f32.mrb[12].mxu1 }
 0x707   :  { %v583_v37 = vadd.f32 %v582_v36, %v543_v34  ;;  %v725_v38 = vpop.f32.mrb[13].mxu1 }
 0x708   :  { %v585_v40 = vpop.f32.mrb[14].mxu1 }
 0x709   :  { %v595_v42 = vsel %vm594_vm6, %v583_v37, 0.0  ;;  %v726_v43 = vpop.f32.mrb[15].mxu1 }
 0x70a   :  { %v605_v44 = vsel %vm604_vm7, %v595_v42, %v599_v39 }
 0x70b   :  { %v607_v45 = vsel %vm606_vm8, %v605_v44, %v602_v41 }
 0x70c   :  { %v609_v46 = vsel %vm608_vm9, %v607_v45, 0.0 }
 0x70d   :  { %610 = vst [vmem:[%s948_s10] sm:$0xff] %v609_v46 }

</bundles_post_ra>
